<compile_context>
chip_gen: v7x
topology: tpu7x:2x2x1
jax: 0.10.0
libtpu: 0.0.40
codegen_flags: <defaults>
</compile_context>

<pallas_src>
import jax
import jax.numpy as jnp
from jax.experimental import pallas as pl
from jax.experimental.pallas import tpu as pltpu

LANE = 128  # pad the tiny output dim to one full lane tile (dense stores)


def ef_fusion_kernel(a_ref, v_ref, w_ref, b_ref, o_ref):
    # a_ref / v_ref: [TB, D] modality-feature row tiles. Cast on-chip so bf16
    # producers don't force a separate HBM upcast pass in the wrapper
    # (also keeps all VPU math in f32 - required on v5e, which has no bf16 VALU).
    a = a_ref[...].astype(jnp.float32)
    v = v_ref[...].astype(jnp.float32)
    # Pairwise mean: the 0.5 is pre-folded into the weight, so just add here.
    fused = a + v
    # Dropout(p=0.25) -> identity in eval mode.
    out = jnp.dot(fused, w_ref[...], preferred_element_type=jnp.float32)
    o_ref[...] = out + b_ref[...]


def ef_model_forward(audio_feat, video_feat, w_t, bias, *, row_tile=2048):
    """Fusion head of EFModel.

    audio_feat, video_feat: [B, D] feature outputs of modelA / modelV
                            (any float dtype; streamed as-is, cast on-chip).
    w_t:  [D, O] Linear weight, pre-transposed (torch weight is [O, D]).
    bias: [O].
    Returns [B, O] float32 logits.
    """
    B, D = audio_feat.shape
    O = w_t.shape[1]

    # Fold the 1/2 of the two-modality mean into the tiny weight once
    # (trace-time constant work on a [D, O] array).
    w_half = (0.5 * w_t).astype(jnp.float32)

    # Lane-dense output: pad O -> multiple of 128 with zero columns so every
    # output store is a full unmasked vst tile; wrapper slices back to [:, :O].
    OP = max(LANE, ((O + LANE - 1) // LANE) * LANE)
    w_pad = jnp.zeros((D, OP), jnp.float32).at[:, :O].set(w_half)
    b_pad = jnp.zeros((1, OP), jnp.float32).at[0, :O].set(bias.astype(jnp.float32))

    # Row tile: largest multiple-of-8 tile that fits comfortably in VMEM on all
    # generations.  row_tile=2048 -> 2 inputs x 2 bufs x 2048x512x4B = 16 MiB
    # of input buffers (+ ~2 MiB output bufs), safely under v7x's 64 MiB VMEM
    # and the 32 MiB scoped default.
    TB = B if B <= row_tile else row_tile
    grid = (pl.cdiv(B, TB),)

    out_padded = pl.pallas_call(
        ef_fusion_kernel,
        out_shape=jax.ShapeDtypeStruct((B, OP), jnp.float32),
        grid_spec=pltpu.PrefetchScalarGridSpec(
            num_scalar_prefetch=0,
            grid=grid,
            in_specs=[
                pl.BlockSpec((TB, D), lambda i: (i, 0)),   # audio feature rows
                pl.BlockSpec((TB, D), lambda i: (i, 0)),   # video feature rows
                pl.BlockSpec((D, OP), lambda i: (0, 0)),   # 0.5 * W^T (padded, resident)
                pl.BlockSpec((1, OP), lambda i: (0, 0)),   # bias (padded, resident)
            ],
            out_specs=pl.BlockSpec((TB, OP), lambda i: (i, 0)),
        ),
        compiler_params=pltpu.CompilerParams(
            # Rows are independent -> shard across both TensorCores on v7x.
            dimension_semantics=("parallel",),
            vmem_limit_bytes=64 * 1024 * 1024,
        ),
    )(audio_feat, video_feat, w_pad, b_pad)

    return out_padded[:, :O]


if __name__ == "__main__":
    B, D, O = 8, 512, 2
    key = jax.random.PRNGKey(0)
    k_a, k_v, k_w, k_b = jax.random.split(key, 4)

    # Deterministic synthetic modality features (outputs of modelA / modelV).
    audio_feat = jax.random.normal(k_a, (B, D), dtype=jnp.float32)
    video_feat = jax.random.normal(k_v, (B, D), dtype=jnp.float32)

    # Deterministic Linear(512, 2) parameters (PyTorch default-like uniform init).
    bound = 1.0 / (D ** 0.5)
    w = jax.random.uniform(k_w, (O, D), minval=-bound, maxval=bound,
                           dtype=jnp.float32)          # torch layout [out, in]
    b = jax.random.uniform(k_b, (O,), minval=-bound, maxval=bound,
                           dtype=jnp.float32)

    out = ef_model_forward(audio_feat, video_feat, w.T, b)
    out = jax.block_until_ready(out)

    # Pure-JAX reference check of the fusion head.
    ref = ((audio_feat + video_feat) * 0.5) @ w.T + b
    assert out.shape == (B, O)
    assert jnp.allclose(out, ref, atol=1e-4, rtol=1e-4), "mismatch vs reference"

    print("KERNEL_OK")
</pallas_src>

<mosaic_0001>
module attributes {stable_mosaic.version = 11 : i64} {
  func.func @ef_fusion_kernel(%arg0: i32, %arg1: memref<8x512xf32, #tpu.memory_space<vmem>>, %arg2: memref<8x512xf32, #tpu.memory_space<vmem>>, %arg3: memref<512x128xf32, #tpu.memory_space<vmem>>, %arg4: memref<1x128xf32, #tpu.memory_space<vmem>>, %arg5: memref<8x128xf32, #tpu.memory_space<vmem>>) attributes {dimension_semantics = [#tpu.dimension_semantics<parallel>], iteration_bounds = array<i64: 1>, scalar_prefetch = 0 : i64, scratch_operands = 0 : i64, tpu.core_type = #tpu.core_type<tc>, window_params = [{transform_indices = @transform_0, window_bounds = array<i64: 8, 512>}, {transform_indices = @transform_1, window_bounds = array<i64: 8, 512>}, {pipeline_mode = #tpu.pipeline_mode<synchronous>, transform_indices = @transform_2, window_bounds = array<i64: 512, 128>}, {pipeline_mode = #tpu.pipeline_mode<synchronous>, transform_indices = @transform_3, window_bounds = array<i64: 1, 128>}, {transform_indices = @transform_4, window_bounds = array<i64: 8, 128>}]} {
    %c0 = arith.constant 0 : index
    %c0_0 = arith.constant 0 : index
    %0 = vector.load %arg1[%c0, %c0_0] : memref<8x512xf32, #tpu.memory_space<vmem>>, vector<8x512xf32>
    %c0_1 = arith.constant 0 : index
    %c0_2 = arith.constant 0 : index
    %1 = vector.load %arg2[%c0_1, %c0_2] : memref<8x512xf32, #tpu.memory_space<vmem>>, vector<8x512xf32>
    %2 = arith.addf %0, %1 : vector<8x512xf32>
    %c0_3 = arith.constant 0 : index
    %c0_4 = arith.constant 0 : index
    %3 = vector.load %arg3[%c0_3, %c0_4] : memref<512x128xf32, #tpu.memory_space<vmem>>, vector<512x128xf32>
    %cst = arith.constant dense<0.000000e+00> : vector<8x128xf32>
    %4 = tpu.matmul %2, %3, %cst {dimension_numbers = #tpu.dot_dimension_numbers<[1], [0], [0], [1], [0, 0, 1, 1], [], []>} : vector<8x512xf32>, vector<512x128xf32>, vector<8x128xf32> -> vector<8x128xf32>
    %c0_5 = arith.constant 0 : index
    %c0_6 = arith.constant 0 : index
    %5 = vector.load %arg4[%c0_5, %c0_6] : memref<1x128xf32, #tpu.memory_space<vmem>>, vector<1x128xf32>
    %6 = vector.broadcast %5 : vector<1x128xf32> to vector<8x128xf32>
    %7 = arith.addf %4, %6 : vector<8x128xf32>
    %c0_7 = arith.constant 0 : index
    %c0_8 = arith.constant 0 : index
    %8 = vector.load %arg5[%c0_7, %c0_8] : memref<8x128xf32, #tpu.memory_space<vmem>>, vector<8x128xf32>
    tpu.vector_store %arg5[%c0_7, %c0_8], %7 {strides = array<i32>} : memref<8x128xf32, #tpu.memory_space<vmem>>, vector<8x128xf32>,
    return
  }
  func.func @transform_0(%arg0: i32) -> (i32, i32) {
    %c0_i32 = arith.constant 0 : i32
    %c0_i32_0 = arith.constant 0 : i32
    return %arg0, %c0_i32 : i32, i32
  }
  func.func @transform_1(%arg0: i32) -> (i32, i32) {
    %c0_i32 = arith.constant 0 : i32
    %c0_i32_0 = arith.constant 0 : i32
    return %arg0, %c0_i32 : i32, i32
  }
  func.func @transform_2(%arg0: i32) -> (i32, i32) {
    %c0_i32 = arith.constant 0 : i32
    %c0_i32_0 = arith.constant 0 : i32
    %c0_i32_1 = arith.constant 0 : i32
    return %c0_i32, %c0_i32_0 : i32, i32
  }
  func.func @transform_3(%arg0: i32) -> (i32, i32) {
    %c0_i32 = arith.constant 0 : i32
    %c0_i32_0 = arith.constant 0 : i32
    %c0_i32_1 = arith.constant 0 : i32
    return %c0_i32, %c0_i32_0 : i32, i32
  }
  func.func @transform_4(%arg0: i32) -> (i32, i32) {
    %c0_i32 = arith.constant 0 : i32
    %c0_i32_0 = arith.constant 0 : i32
    return %arg0, %c0_i32 : i32, i32
  }
}

</mosaic_0001>

<bundles_post_ra>
// kernel: tpu_custom_call.1
= control target key start
LH: loop header
LB: loop body
LE: loop exit
PB: predicated region body
PF: predicated region fallthrough
CT: control target
= control target key end

     0   :  { %9 = vsyncpa [#allocation3], 0  ;;  %s660_s0 = inlined_call_operand.hbm [shape: f32[8,512], index: 0, kind: input, shape index: {}]   ;;  %s661_s1 = inlined_call_operand.hbm [shape: f32[8,512], index: 1, kind: input, shape index: {}]   ;;  %s662_s2 = inlined_call_operand.hbm [shape: f32[512,128], index: 2, kind: input, shape index: {}]   ;;  %s663_s3 = inlined_call_operand.hbm [shape: f32[1,128], index: 3, kind: input, shape index: {}]   ;;  %s664_s4 = inlined_call_operand.hbm [shape: f32[8,128], index: 4, kind: output, shape index: {}]  }
   0x1   :  { %10 = vsyncpa [#allocation6], 0 }
   0x2   :  { %11 = vsyncpa [#allocation9], 0 }
   0x3   :  { %12 = vsyncpa [#allocation4], 0  ;;  %s568_s15 = smov [#allocation5]   ;;  %s569_s17 = smov [#allocation2]  }
   0x4   :  { %s29_s16 = sshll.u32 %s568_s15, 4  ;;  %s19_s18 = sshll.u32 %s569_s17, 4  ;;  %s30_s16 = int_to_ptr.vmem [resolvable:$true] %s29_s16  ;;  %s20_s18 = int_to_ptr.vmem [resolvable:$true] %s19_s18 }
   0x5   :  { %s450_s21 = scalar_lea.hbm %s661_s1, 512 }
   0x6   :  { %p451_p0 = scmp.ne.s32.totalorder %s661_s1, %s450_s21  ;;  %p454_p1 = scmp.lt.u32.totalorder %s450_s21, %s661_s1 }
   0x8   :  { %p456_p2 = pnand %p454_p1, %p451_p0 }
   0xa   :  { %459 = shalt.err (!%p456_p2)
}
   0xb   :  { %s460_s26 = scalar_lea.vmem %s30_s16, 512  ;;  %p465_p4 = scmp.lt.s32.totalorder %s30_s16, %s30_s16 }
   0xc   :  { %p461_p3 = scmp.ne.s32.totalorder %s30_s16, %s460_s26  ;;  %p466_p5 = scmp.lt.s32.totalorder %s460_s26, %s460_s26 }
   0xe   :  { %p467_p6 = por %p466_p5, %p465_p4 }
  0x10   :  { %p468_p7 = pnand %p467_p6, %p461_p3 }
  0x12   :  { %471 = shalt.err (!%p468_p7)
}
  0x13   :  { %32 = dma.hbm_to_vmem [thread:$0]  %s661_s1, 512, %s30_s16, [#allocation6]  }
  0x14   :  { %s472_s5 = scalar_lea.hbm %s660_s0, 512 }
  0x15   :  { %p473_p8 = scmp.ne.s32.totalorder %s660_s0, %s472_s5  ;;  %p476_p9 = scmp.lt.u32.totalorder %s472_s5, %s660_s0 }
  0x17   :  { %p478_p10 = pnand %p476_p9, %p473_p8 }
  0x19   :  { %481 = shalt.err (!%p478_p10)
}
  0x1a   :  { %s482_s10 = scalar_lea.vmem %s20_s18, 512  ;;  %p487_p12 = scmp.lt.s32.totalorder %s20_s18, %s20_s18 }
  0x1b   :  { %p483_p11 = scmp.ne.s32.totalorder %s20_s18, %s482_s10  ;;  %p488_p13 = scmp.lt.s32.totalorder %s482_s10, %s482_s10 }
  0x1d   :  { %p489_p0 = por %p488_p13, %p487_p12 }
  0x1f   :  { %p490_p1 = pnand %p489_p0, %p483_p11 }
  0x21   :  { %493 = shalt.err (!%p490_p1)
}
  0x22   :  { %22 = dma.hbm_to_vmem [thread:$0]  %s660_s0, 512, %s20_s18, [#allocation3]  }
  0x23   :  { %s570_s12 = smov [#allocation7]   ;;  %s494_s16 = scalar_lea.hbm %s662_s2, 8192 }
  0x24   :  { %s38_s13 = sshll.u32 %s570_s12, 4  ;;  %p495_p2 = scmp.ne.s32.totalorder %s662_s2, %s494_s16  ;;  %s39_s13 = int_to_ptr.vmem [resolvable:$true] %s38_s13 }
  0x25   :  { %p498_p3 = scmp.lt.u32.totalorder %s494_s16, %s662_s2 }
  0x27   :  { %p500_p4 = pnand %p498_p3, %p495_p2 }
  0x29   :  { %503 = shalt.err (!%p500_p4)
}
  0x2a   :  { %s504_s22 = scalar_lea.vmem %s39_s13, 8192  ;;  %p509_p6 = scmp.lt.s32.totalorder %s39_s13, %s39_s13 }
  0x2b   :  { %p505_p5 = scmp.ne.s32.totalorder %s39_s13, %s504_s22  ;;  %p510_p7 = scmp.lt.s32.totalorder %s504_s22, %s504_s22 }
  0x2d   :  { %p511_p8 = por %p510_p7, %p509_p6 }
  0x2f   :  { %p512_p9 = pnand %p511_p8, %p505_p5 }
  0x31   :  { %515 = shalt.err (!%p512_p9)
}
  0x32   :  { %s571_s0 = smov 128   ;;  %s572_s18 = smov 8  }
  0x33   :  { %44 = dma.hbm_to_vmem [thread:$0]  %s662_s2, 8192, %s39_s13, [#allocation6], %s571_s0, %s571_s0, %s572_s18  }
  0x34   :  { %s573_s25 = smov [#allocation8]   ;;  %s516_s29 = scalar_lea.hbm %s663_s3, 16 }
  0x35   :  { %s51_s26 = sshll.u32 %s573_s25, 4  ;;  %p517_p10 = scmp.ne.s32.totalorder %s663_s3, %s516_s29  ;;  %s52_s26 = int_to_ptr.vmem [resolvable:$true] %s51_s26 }
  0x36   :  { %p520_p11 = scmp.lt.u32.totalorder %s516_s29, %s663_s3 }
  0x38   :  { %p522_p12 = pnand %p520_p11, %p517_p10 }
  0x3a   :  { %525 = shalt.err (!%p522_p12)
}
  0x3b   :  { %s526_s8 = scalar_lea.vmem %s52_s26, 16  ;;  %s530_s2 = scalar_lea.vmem %s52_s26, 32 }
  0x3c   :  { %p527_p13 = scmp.ne.s32.totalorder %s52_s26, %s526_s8  ;;  %p531_p0 = scmp.lt.s32.totalorder %s52_s26, %s52_s26 }
  0x3d   :  { %p532_p1 = scmp.lt.s32.totalorder %s530_s2, %s526_s8 }
  0x3f   :  { %p533_p2 = por %p532_p1, %p531_p0 }
  0x41   :  { %p534_p3 = pnand %p533_p2, %p527_p13 }
  0x43   :  { %537 = shalt.err (!%p534_p3)
}
  0x44   :  { %54 = dma.hbm_to_vmem [thread:$0]  %s663_s3, 16, %s52_s26, [#allocation9]  }
  0x45   :  { %560 = dma.done.wait [#allocation3], 512  }
  0x46   :  { %561 = vsyncadd [#allocation3], 4294966784 }
  0x47   :  { %562 = dma.done.wait [#allocation6], 8704  }
  0x48   :  { %563 = vsyncadd [#allocation6], 4294958592 }
  0x49   :  { %564 = dma.done.wait [#allocation9], 16  }
  0x4a   :  { %565 = vsyncadd [#allocation9], 4294967280  ;;  %v95_v0 = vld [vmem:[#allocation7 + $0x80] sm:$0xff]  ;;  %v96_v1 = vld [vmem:[#allocation7 + $0x88] sm:$0xff]  ;;  %s574_s3 = smov [#allocation10]  }
  0x4b   :  { %v79_v2 = vld [vmem:[#allocation7] sm:$0xff]  ;;  %v379_v3 = vpack.c.bf16 %v96_v1, %v95_v0  ;;  %v80_v4 = vld [vmem:[#allocation7 + $0x8] sm:$0xff]  ;;  %v97_v11 = vld [vmem:[#allocation7 + $0x90] sm:$0xff]  ;;  %s297_s1 = sshll.u32 %s574_s3, 4  ;;  %s298_s1 = int_to_ptr.vmem [resolvable:$true] %s297_s1 }
  0x4c   :  { %v127_v5 = vld [vmem:[#allocation7 + $0x180] sm:$0xff]  ;;  %v128_v6 = vld [vmem:[#allocation7 + $0x188] sm:$0xff]  ;;  %v381_v7 = vpack.c.bf16 %v80_v4, %v79_v2  ;;  %v98_v13 = vld [vmem:[#allocation7 + $0x98] sm:$0xff]  ;;  %s538_s11 = scalar_lea.vmem %s298_s1, 128  ;;  %p543_p5 = scmp.lt.s32.totalorder %s298_s1, %s298_s1 }
  0x4d   :  { %v411_v8 = vpack.c.bf16 %v128_v6, %v127_v5  ;;  %v111_v9 = vld [vmem:[#allocation7 + $0x100] sm:$0xff]  ;;  %v112_v10 = vld [vmem:[#allocation7 + $0x108] sm:$0xff]  ;;  %380 = vmatprep.subr.bf16.mxu0 %v379_v3  ;;  %v81_v14 = vld [vmem:[#allocation7 + $0x10] sm:$0xff]  ;;  %v383_v16 = vpack.c.bf16 %v98_v13, %v97_v11  ;;  %p539_p4 = scmp.ne.s32.totalorder %s298_s1, %s538_s11  ;;  %p544_p6 = scmp.lt.s32.totalorder %s538_s11, %s538_s11 }
  0x4e   :  { %v413_v12 = vpack.c.bf16 %v112_v10, %v111_v9  ;;  %v82_v15 = vld [vmem:[#allocation7 + $0x18] sm:$0xff]  ;;  %382 = vmatpush3.bf16.msra.mxu0 %v381_v7  ;;  %v129_v18 = vld [vmem:[#allocation7 + $0x190] sm:$0xff]  ;;  %v99_v23 = vld [vmem:[#allocation7 + $0xa0] sm:$0xff] }
  0x4f   :  { %412 = vmatprep.subr.bf16.mxu1 %v411_v8  ;;  %v385_v17 = vpack.c.bf16 %v82_v15, %v81_v14  ;;  %v130_v19 = vld [vmem:[#allocation7 + $0x198] sm:$0xff]  ;;  %v113_v20 = vld [vmem:[#allocation7 + $0x110] sm:$0xff]  ;;  %v100_v24 = vld [vmem:[#allocation7 + $0xa8] sm:$0xff]  ;;  %384 = vmatprep.subr.bf16.mxu0 %v383_v16  ;;  %p545_p7 = por %p544_p6, %p543_p5 }
  0x50   :  { %414 = vmatpush3.bf16.msra.mxu1 %v413_v12  ;;  %v415_v21 = vpack.c.bf16 %v130_v19, %v129_v18  ;;  %v114_v22 = vld [vmem:[#allocation7 + $0x118] sm:$0xff]  ;;  %v387_v26 = vpack.c.bf16 %v100_v24, %v99_v23  ;;  %v83_v27 = vld [vmem:[#allocation7 + $0x20] sm:$0xff]  ;;  %v84_v28 = vld [vmem:[#allocation7 + $0x28] sm:$0xff] }
  0x51   :  { %v417_v25 = vpack.c.bf16 %v114_v22, %v113_v20  ;;  %v131_v29 = vld [vmem:[#allocation7 + $0x1a0] sm:$0xff]  ;;  %v132_v30 = vld [vmem:[#allocation7 + $0x1a8] sm:$0xff]  ;;  %v389_v33 = vpack.c.bf16 %v84_v28, %v83_v27  ;;  %v101_v35 = vld [vmem:[#allocation7 + $0xb0] sm:$0xff]  ;;  %p546_p8 = pnand %p545_p7, %p539_p4 }
  0x52   :  { %416 = vmatprep.subr.bf16.mxu1 %v415_v21  ;;  %v115_v31 = vld [vmem:[#allocation7 + $0x120] sm:$0xff]  ;;  %v116_v32 = vld [vmem:[#allocation7 + $0x128] sm:$0xff]  ;;  %386 = vmatpush3.bf16.msra.mxu0 %v385_v17  ;;  %v419_v34 = vpack.c.bf16 %v132_v30, %v131_v29  ;;  %v102_v36 = vld [vmem:[#allocation7 + $0xb8] sm:$0xff] }
  0x53   :  { %v85_v37 = vld [vmem:[#allocation7 + $0x30] sm:$0xff]  ;;  %388 = vmatprep.subr.bf16.mxu0 %v387_v26  ;;  %v421_v38 = vpack.c.bf16 %v116_v32, %v115_v31  ;;  %v391_v39 = vpack.c.bf16 %v102_v36, %v101_v35  ;;  %v86_v40 = vld [vmem:[#allocation7 + $0x38] sm:$0xff]  ;;  %v103_v46 = vld [vmem:[#allocation7 + $0xc0] sm:$0xff] }
  0x54   :  { %418 = vmatpush3.bf16.msra.mxu1 %v417_v25  ;;  %v133_v41 = vld [vmem:[#allocation7 + $0x1b0] sm:$0xff]  ;;  %v134_v42 = vld [vmem:[#allocation7 + $0x1b8] sm:$0xff]  ;;  %v104_v47 = vld [vmem:[#allocation7 + $0xc8] sm:$0xff]  ;;  %v393_v48 = vpack.c.bf16 %v86_v40, %v85_v37 }
  0x55   :  { %420 = vmatprep.subr.bf16.mxu1 %v419_v34  ;;  %v423_v43 = vpack.c.bf16 %v134_v42, %v133_v41  ;;  %v117_v44 = vld [vmem:[#allocation7 + $0x130] sm:$0xff]  ;;  %v118_v45 = vld [vmem:[#allocation7 + $0x138] sm:$0xff]  ;;  %v135_v49 = vld [vmem:[#allocation7 + $0x1c0] sm:$0xff]  ;;  %v395_v52 = vpack.c.bf16 %v104_v47, %v103_v46 }
  0x56   :  { %390 = vmatpush3.bf16.msra.mxu0 %v389_v33  ;;  %v136_v50 = vld [vmem:[#allocation7 + $0x1c8] sm:$0xff]  ;;  %v425_v51 = vpack.c.bf16 %v118_v45, %v117_v44  ;;  %v87_v53 = vld [vmem:[#allocation7 + $0x40] sm:$0xff]  ;;  %v105_v58 = vld [vmem:[#allocation7 + $0xd0] sm:$0xff] }
  0x57   :  { %392 = vmatprep.subr.bf16.mxu0 %v391_v39  ;;  %v88_v54 = vld [vmem:[#allocation7 + $0x48] sm:$0xff]  ;;  %v119_v55 = vld [vmem:[#allocation7 + $0x140] sm:$0xff]  ;;  %v427_v56 = vpack.c.bf16 %v136_v50, %v135_v49  ;;  %v106_v59 = vld [vmem:[#allocation7 + $0xd8] sm:$0xff] }
  0x58   :  { %422 = vmatpush3.bf16.msra.mxu1 %v421_v38  ;;  %v120_v57 = vld [vmem:[#allocation7 + $0x148] sm:$0xff]  ;;  %v137_v60 = vld [vmem:[#allocation7 + $0x1d0] sm:$0xff]  ;;  %v138_v61 = vld [vmem:[#allocation7 + $0x1d8] sm:$0xff]  ;;  %v397_v62 = vpack.c.bf16 %v88_v54, %v87_v53  ;;  %v399_v0 = vpack.c.bf16 %v106_v59, %v105_v58 }
  0x59   :  { %424 = vmatprep.subr.bf16.mxu1 %v423_v43  ;;  %v429_v63 = vpack.c.bf16 %v120_v57, %v119_v55  ;;  %v89_v1 = vld [vmem:[#allocation7 + $0x50] sm:$0xff]  ;;  %v90_v2 = vld [vmem:[#allocation7 + $0x58] sm:$0xff]  ;;  %v431_v4 = vpack.c.bf16 %v138_v61, %v137_v60  ;;  %v107_v6 = vld [vmem:[#allocation7 + $0xe0] sm:$0xff] }
  0x5a   :  { %394 = vmatpush3.bf16.msra.mxu0 %v393_v48  ;;  %v121_v3 = vld [vmem:[#allocation7 + $0x150] sm:$0xff]  ;;  %v122_v5 = vld [vmem:[#allocation7 + $0x158] sm:$0xff]  ;;  %v108_v7 = vld [vmem:[#allocation7 + $0xe8] sm:$0xff]  ;;  %v401_v10 = vpack.c.bf16 %v90_v2, %v89_v1 }
  0x5b   :  { %396 = vmatprep.subr.bf16.mxu0 %v395_v52  ;;  %v139_v8 = vld [vmem:[#allocation7 + $0x1e0] sm:$0xff]  ;;  %v140_v9 = vld [vmem:[#allocation7 + $0x1e8] sm:$0xff]  ;;  %v433_v14 = vpack.c.bf16 %v122_v5, %v121_v3  ;;  %v403_v15 = vpack.c.bf16 %v108_v7, %v107_v6  ;;  %v109_v20 = vld [vmem:[#allocation7 + $0xf0] sm:$0xff] }
  0x5c   :  { %426 = vmatpush3.bf16.msra.mxu1 %v425_v51  ;;  %v91_v11 = vld [vmem:[#allocation7 + $0x60] sm:$0xff]  ;;  %v92_v12 = vld [vmem:[#allocation7 + $0x68] sm:$0xff]  ;;  %v435_v19 = vpack.c.bf16 %v140_v9, %v139_v8  ;;  %v110_v21 = vld [vmem:[#allocation7 + $0xf8] sm:$0xff] }
  0x5d   :  { %428 = vmatprep.subr.bf16.mxu1 %v427_v56  ;;  %v123_v13 = vld [vmem:[#allocation7 + $0x160] sm:$0xff]  ;;  %v124_v16 = vld [vmem:[#allocation7 + $0x168] sm:$0xff]  ;;  %v70_v23 = vld [vmem:[#allocation2 + $0x18] sm:$0xff]  ;;  %v405_v27 = vpack.c.bf16 %v92_v12, %v91_v11  ;;  %v407_v30 = vpack.c.bf16 %v110_v21, %v109_v20 }
  0x5e   :  { %398 = vmatpush3.bf16.msra.mxu0 %v397_v62  ;;  %v68_v17 = vld [vmem:[#allocation2 + $0x8] sm:$0xff]  ;;  %v141_v24 = vld [vmem:[#allocation7 + $0x1f0] sm:$0xff]  ;;  %v142_v25 = vld [vmem:[#allocation7 + $0x1f8] sm:$0xff]  ;;  %v437_v29 = vpack.c.bf16 %v124_v16, %v123_v13 }
  0x5f   :  { %400 = vmatprep.subr.bf16.mxu0 %v399_v0  ;;  %v72_v18 = vld [vmem:[#allocation5 + $0x8] sm:$0xff]  ;;  %v74_v26 = vld [vmem:[#allocation5 + $0x18] sm:$0xff]  ;;  %v93_v31 = vld [vmem:[#allocation7 + $0x70] sm:$0xff]  ;;  %v439_v33 = vpack.c.bf16 %v142_v25, %v141_v24 }
  0x60   :  { %430 = vmatpush3.bf16.msra.mxu1 %v429_v63  ;;  %v76_v22 = vadd.f32 %v72_v18, %v68_v17  ;;  %v78_v28 = vadd.f32 %v74_v26, %v70_v23  ;;  %v94_v32 = vld [vmem:[#allocation7 + $0x78] sm:$0xff]  ;;  %v125_v34 = vld [vmem:[#allocation7 + $0x170] sm:$0xff]  ;;  %v67_v37 = vld [vmem:[#allocation2] sm:$0xff] }
  0x61   :  { %432 = vmatprep.subr.bf16.mxu1 %v431_v4  ;;  %v126_v35 = vld [vmem:[#allocation7 + $0x178] sm:$0xff]  ;;  %v409_v36 = vpack.c.bf16 %v94_v32, %v93_v31  ;;  %v71_v38 = vld [vmem:[#allocation5] sm:$0xff]  ;;  %v69_v40 = vld [vmem:[#allocation2 + $0x10] sm:$0xff] }
  0x62   :  { %402 = vmatpush3.bf16.msra.mxu0 %v401_v10  ;;  %214 = vmatprep.mubr.f32.mxu0 %v76_v22  ;;  %v441_v39 = vpack.c.bf16 %v126_v35, %v125_v34  ;;  %v73_v41 = vld [vmem:[#allocation5 + $0x10] sm:$0xff]  ;;  %v75_v42 = vadd.f32 %v71_v38, %v67_v37  ;;  %v308_v45 = vld [vmem:[#allocation8] ss:$0 sm:$0xff] }
  0x63   :  { %404 = vmatprep.subr.bf16.mxu0 %v403_v15  ;;  %284 = vmatprep.mubr.f32.mxu1 %v78_v28  ;;  %v77_v43 = vadd.f32 %v73_v41, %v69_v40 }
  0x64   :  { %434 = vmatpush3.bf16.msra.mxu1 %v433_v14 }
  0x65   :  { %436 = vmatprep.subr.bf16.mxu1 %v435_v19 }
  0x66   :  { %406 = vmatpush3.bf16.msra.mxu0 %v405_v27 }
  0x67   :  { %408 = vmatprep.subr.bf16.mxu0 %v407_v30 }
  0x68   :  { %438 = vmatpush3.bf16.msra.mxu1 %v437_v29 }
  0x69   :  { %440 = vmatprep.subr.bf16.mxu1 %v439_v33 }
  0x6a   :  { %410 = vmatpush3.bf16.msra.mxu0 %v409_v36 }
  0x6c   :  { %442 = vmatpush3.bf16.msra.mxu1 %v441_v39 }
  0x6d   :  { %215 = vmatmul.mubr.f32.vlgmr.msra.gmra.mrb[0].mxu0 %v75_v42 }
  0x6f   :  { %285 = vmatmul.mubr.f32.vlgmr.msra.gmra.mrb[0].mxu1 %v77_v43 }
 0x140   :  { %v341_v44 = vpop.f32.mrb[0].mxu0 }
 0x141   :  { %v342_v46 = vpop.f32.mrb[1].mxu0 }
 0x142   :  { %v376_v47 = vpop.f32.mrb[0].mxu1  ;;  %v343_v48 = vadd.f32 %v342_v46, %v341_v44 }
 0x143   :  { %v377_v49 = vpop.f32.mrb[1].mxu1 }
 0x144   :  { %v378_v50 = vadd.f32 %v377_v49, %v376_v47  ;;  %v217_v51 = vadd.f32 %v343_v48, %v308_v45 }
 0x146   :  { %v287_v52 = vadd.f32 %v378_v50, %v217_v51 }
 0x148   :  { %290 = vst [vmem:[#allocation10] sm:$0xff] %v287_v52 }
 0x149   :  { %549 = shalt.err (!%p546_p8)
}
 0x14a   :  { %s550_s14 = scalar_lea.hbm %s664_s4, 128 }
 0x14b   :  { %p551_p9 = scmp.ne.s32.totalorder %s664_s4, %s550_s14  ;;  %p554_p10 = scmp.lt.u32.totalorder %s550_s14, %s664_s4 }
 0x14d   :  { %p556_p11 = pnand %p554_p10, %p551_p9 }
 0x14f   :  { %559 = shalt.err (!%p556_p11)
}
 0x150   :  { %300 = dma.vmem_to_hbm [thread:$0]  %s298_s1, 128, %s664_s4, [#allocation4]  }
 0x151   :  { %566 = dma.done.wait [#allocation4], 128  }
 0x152   :  { %567 = vsyncadd [#allocation4], 4294967168 }
 0x153   :  { %304 = vsyncpa [#allocation3], 1 }
 0x154   :  { %305 = vsyncpa [#allocation6], 1 }
 0x155   :  { %306 = vsyncpa [#allocation9], 1 }
 0x156   :  { %307 = vsyncpa [#allocation4], 1 }

</bundles_post_ra>
